<compile_context>
chip_gen: v7x
topology: tpu7x:2x2x1
jax: 0.10.0
libtpu: 0.0.40
codegen_flags: <defaults>
</compile_context>

<pallas_src>
import jax
import jax.numpy as jnp
from jax.experimental import pallas as pl
from jax.experimental.pallas import tpu as pltpu

EPS = 1e-5  # nn.LayerNorm default


def prenorm_linear_kernel(x_ref, gamma_ref, beta_ref, w_ref, b_ref, o_ref, y_ref):
    # x_ref: (tile_rows, D); gamma/beta: (1, D); w: (D, tile_n); b: (1, tile_n)
    # y_ref: (tile_rows, D) scratch holding LayerNorm(x) for the current row
    # tile, computed once at j == 0 and reused for every output-feature tile.

    @pl.when(pl.program_id(1) == 0)
    def _():
        x = x_ref[...].astype(jnp.float32)
        # LayerNorm over the last dim (biased variance, eps inside rsqrt —
        # matches nn.LayerNorm).  Statistics kept in f32 regardless of dtype.
        mean = jnp.mean(x, axis=-1, keepdims=True)
        xc = x - mean
        var = jnp.mean(xc * xc, axis=-1, keepdims=True)
        xn = xc * jax.lax.rsqrt(var + EPS)
        y = xn * gamma_ref[...].astype(jnp.float32) + beta_ref[...].astype(jnp.float32)
        # Store in the input dtype: bf16 stays bf16 -> full-rate MXU feed.
        y_ref[...] = y.astype(y_ref.dtype)

    # fn: Linear(dim -> hidden), fused.  f32 accumulation on the MXU.
    out = jnp.dot(y_ref[...], w_ref[...], preferred_element_type=jnp.float32)
    out = out + b_ref[...].astype(jnp.float32)
    o_ref[...] = out.astype(o_ref.dtype)


def prenorm(x, gamma, beta, w, b, *, tile_rows=256, tile_n=None):
    """x: (B, S, D) -> (B, S, H), computing fn(LayerNorm(x)) with fn = Linear."""
    B, S, D = x.shape
    H = w.shape[1]
    rows = B * S

    # Row tiling: default 256 rows per step (good MXU utilization), clamped so
    # tiny inputs don't over-pad; pad ragged row counts with zeros and slice.
    tile_rows = min(tile_rows, pl.cdiv(rows, 8) * 8)
    rows_p = pl.cdiv(rows, tile_rows) * tile_rows

    # Output-feature (N) tiling: lane-dense multiples of 128 when possible.
    if tile_n is None:
        if H % 128 == 0:
            tile_n = next(t for t in (512, 256, 128) if H % t == 0)
        else:
            tile_n = H  # full-extent block; sub-128 H falls back to masked stores
    assert H % tile_n == 0

    x2 = x.reshape(rows, D)
    if rows_p != rows:
        x2 = jnp.pad(x2, ((0, rows_p - rows), (0, 0)))
    gamma2 = gamma.reshape(1, D)
    beta2 = beta.reshape(1, D)
    b2 = b.reshape(1, H)

    grid = (rows_p // tile_rows, H // tile_n)

    cost = pl.CostEstimate(
        flops=2 * rows_p * D * H,
        transcendentals=rows_p,  # one rsqrt per row
        bytes_accessed=(rows_p * D * x.dtype.itemsize
                        + D * H * w.dtype.itemsize
                        + rows_p * H * x.dtype.itemsize),
    )

    out2 = pl.pallas_call(
        prenorm_linear_kernel,
        out_shape=jax.ShapeDtypeStruct((rows_p, H), x.dtype),
        grid_spec=pltpu.PrefetchScalarGridSpec(
            num_scalar_prefetch=0,
            grid=grid,
            in_specs=[
                pl.BlockSpec((tile_rows, D), lambda i, j: (i, 0)),   # x tile
                pl.BlockSpec((1, D), lambda i, j: (0, 0)),           # gamma
                pl.BlockSpec((1, D), lambda i, j: (0, 0)),           # beta
                pl.BlockSpec((D, tile_n), lambda i, j: (0, j)),      # W tile
                pl.BlockSpec((1, tile_n), lambda i, j: (0, j)),      # bias tile
            ],
            out_specs=pl.BlockSpec((tile_rows, tile_n), lambda i, j: (i, j)),
            scratch_shapes=[pltpu.VMEM((tile_rows, D), x.dtype)],    # LayerNorm(x)
        ),
        compiler_params=pltpu.CompilerParams(
            # j axis carries the normalized-x scratch -> "arbitrary"; row axis
            # is independent -> "parallel" (megacore).
            dimension_semantics=("parallel", "arbitrary"),
            vmem_limit_bytes=48 << 20,
        ),
        cost_estimate=cost,
    )(x2, gamma2, beta2, w, b2)

    if rows_p != rows:
        out2 = out2[:rows]
    return out2.reshape(B, S, H)


if __name__ == "__main__":
    # Small demo shapes consistent with the module's forward:
    # x: (B, S, D); fn = Linear(D -> H) with H a multiple of 128 (lane-dense).
    B, S, D, H = 2, 8, 32, 128

    key = jax.random.PRNGKey(0)
    kx, kg, kb, kw, kbias = jax.random.split(key, 5)

    x = jax.random.normal(kx, (B, S, D), dtype=jnp.float32)

    # Deterministic parameter init (shapes from nn.LayerNorm(dim) + Linear fn).
    gamma = 1.0 + 0.1 * jax.random.normal(kg, (D,), dtype=jnp.float32)
    beta = 0.1 * jax.random.normal(kb, (D,), dtype=jnp.float32)
    w = jax.random.normal(kw, (D, H), dtype=jnp.float32) / jnp.sqrt(D)
    b = 0.1 * jax.random.normal(kbias, (H,), dtype=jnp.float32)

    out = prenorm(x, gamma, beta, w, b)
    out = jax.block_until_ready(out)

    # Pure-JAX reference for sanity.
    mean = jnp.mean(x, axis=-1, keepdims=True)
    var = jnp.mean((x - mean) ** 2, axis=-1, keepdims=True)
    ref = ((x - mean) / jnp.sqrt(var + EPS)) * gamma + beta
    ref = ref @ w + b
    assert out.shape == (B, S, H)
    assert jnp.allclose(out, ref, atol=1e-4, rtol=1e-4), "mismatch vs reference"

    print("KERNEL_OK")
</pallas_src>

<mosaic_0001>
module attributes {stable_mosaic.version = 11 : i64} {
  func.func @prenorm_linear_kernel(%arg0: i32, %arg1: i32, %arg2: memref<16x32xf32, #tpu.memory_space<vmem>>, %arg3: memref<1x32xf32, #tpu.memory_space<vmem>>, %arg4: memref<1x32xf32, #tpu.memory_space<vmem>>, %arg5: memref<32x128xf32, #tpu.memory_space<vmem>>, %arg6: memref<1x128xf32, #tpu.memory_space<vmem>>, %arg7: memref<16x128xf32, #tpu.memory_space<vmem>>, %arg8: memref<16x32xf32, #tpu.memory_space<vmem>>) attributes {dimension_semantics = [#tpu.dimension_semantics<parallel>, #tpu.dimension_semantics<arbitrary>], iteration_bounds = array<i64: 1, 1>, scalar_prefetch = 0 : i64, scratch_operands = 1 : i64, tpu.core_type = #tpu.core_type<tc>, window_params = [{transform_indices = @transform_0, window_bounds = array<i64: 16, 32>}, {pipeline_mode = #tpu.pipeline_mode<synchronous>, transform_indices = @transform_1, window_bounds = array<i64: 1, 32>}, {pipeline_mode = #tpu.pipeline_mode<synchronous>, transform_indices = @transform_2, window_bounds = array<i64: 1, 32>}, {transform_indices = @transform_3, window_bounds = array<i64: 32, 128>}, {transform_indices = @transform_4, window_bounds = array<i64: 1, 128>}, {transform_indices = @transform_5, window_bounds = array<i64: 16, 128>}]} {
    %c0_i32 = arith.constant 0 : i32
    %0 = arith.cmpi eq, %arg1, %c0_i32 : i32
    %1 = arith.extui %0 : i1 to i32
    %c0_i32_0 = arith.constant 0 : i32
    %2 = arith.cmpi ne, %1, %c0_i32_0 : i32
    scf.if %2 {
      %c0_8 = arith.constant 0 : index
      %c0_9 = arith.constant 0 : index
      %10 = vector.load %arg2[%c0_8, %c0_9] : memref<16x32xf32, #tpu.memory_space<vmem>>, vector<16x32xf32>
      %cst_10 = arith.constant dense<0.000000e+00> : vector<16xf32>
      %11 = vector.multi_reduction <add>, %10, %cst_10 [1] : vector<16x32xf32> to vector<16xf32>
      %12 = vector.shape_cast %11 : vector<16xf32> to vector<16x1xf32>
      %cst_11 = arith.constant 3.200000e+01 : f32
      %13 = vector.broadcast %cst_11 : f32 to vector<16x1xf32>
      %14 = arith.divf %12, %13 : vector<16x1xf32>
      %15 = vector.broadcast %14 : vector<16x1xf32> to vector<16x32xf32>
      %16 = arith.subf %10, %15 : vector<16x32xf32>
      %17 = arith.mulf %16, %16 : vector<16x32xf32>
      %cst_12 = arith.constant dense<0.000000e+00> : vector<16xf32>
      %18 = vector.multi_reduction <add>, %17, %cst_12 [1] : vector<16x32xf32> to vector<16xf32>
      %19 = vector.shape_cast %18 : vector<16xf32> to vector<16x1xf32>
      %cst_13 = arith.constant 3.200000e+01 : f32
      %20 = vector.broadcast %cst_13 : f32 to vector<16x1xf32>
      %21 = arith.divf %19, %20 : vector<16x1xf32>
      %cst_14 = arith.constant 9.99999974E-6 : f32
      %22 = vector.broadcast %cst_14 : f32 to vector<16x1xf32>
      %23 = arith.addf %21, %22 : vector<16x1xf32>
      %24 = math.rsqrt %23 : vector<16x1xf32>
      %25 = vector.broadcast %24 : vector<16x1xf32> to vector<16x32xf32>
      %26 = arith.mulf %16, %25 : vector<16x32xf32>
      %c0_15 = arith.constant 0 : index
      %c0_16 = arith.constant 0 : index
      %27 = vector.load %arg3[%c0_15, %c0_16] : memref<1x32xf32, #tpu.memory_space<vmem>>, vector<1x32xf32>
      %28 = vector.broadcast %27 : vector<1x32xf32> to vector<16x32xf32>
      %29 = arith.mulf %26, %28 : vector<16x32xf32>
      %c0_17 = arith.constant 0 : index
      %c0_18 = arith.constant 0 : index
      %30 = vector.load %arg4[%c0_17, %c0_18] : memref<1x32xf32, #tpu.memory_space<vmem>>, vector<1x32xf32>
      %31 = vector.broadcast %30 : vector<1x32xf32> to vector<16x32xf32>
      %32 = arith.addf %29, %31 : vector<16x32xf32>
      %c0_19 = arith.constant 0 : index
      %c0_20 = arith.constant 0 : index
      %33 = vector.load %arg8[%c0_19, %c0_20] : memref<16x32xf32, #tpu.memory_space<vmem>>, vector<16x32xf32>
      tpu.vector_store %arg8[%c0_19, %c0_20], %32 {strides = array<i32>} : memref<16x32xf32, #tpu.memory_space<vmem>>, vector<16x32xf32>,
    } else {
    }
    %c0 = arith.constant 0 : index
    %c0_1 = arith.constant 0 : index
    %3 = vector.load %arg8[%c0, %c0_1] : memref<16x32xf32, #tpu.memory_space<vmem>>, vector<16x32xf32>
    %c0_2 = arith.constant 0 : index
    %c0_3 = arith.constant 0 : index
    %4 = vector.load %arg5[%c0_2, %c0_3] : memref<32x128xf32, #tpu.memory_space<vmem>>, vector<32x128xf32>
    %cst = arith.constant dense<0.000000e+00> : vector<16x128xf32>
    %5 = tpu.matmul %3, %4, %cst {dimension_numbers = #tpu.dot_dimension_numbers<[1], [0], [0], [1], [0, 0, 1, 1], [], []>} : vector<16x32xf32>, vector<32x128xf32>, vector<16x128xf32> -> vector<16x128xf32>
    %c0_4 = arith.constant 0 : index
    %c0_5 = arith.constant 0 : index
    %6 = vector.load %arg6[%c0_4, %c0_5] : memref<1x128xf32, #tpu.memory_space<vmem>>, vector<1x128xf32>
    %7 = vector.broadcast %6 : vector<1x128xf32> to vector<16x128xf32>
    %8 = arith.addf %5, %7 : vector<16x128xf32>
    %c0_6 = arith.constant 0 : index
    %c0_7 = arith.constant 0 : index
    %9 = vector.load %arg7[%c0_6, %c0_7] : memref<16x128xf32, #tpu.memory_space<vmem>>, vector<16x128xf32>
    tpu.vector_store %arg7[%c0_6, %c0_7], %8 {strides = array<i32>} : memref<16x128xf32, #tpu.memory_space<vmem>>, vector<16x128xf32>,
    return
  }
  func.func @transform_0(%arg0: i32, %arg1: i32) -> (i32, i32) {
    %c0_i32 = arith.constant 0 : i32
    %c0_i32_0 = arith.constant 0 : i32
    return %arg0, %c0_i32 : i32, i32
  }
  func.func @transform_1(%arg0: i32, %arg1: i32) -> (i32, i32) {
    %c0_i32 = arith.constant 0 : i32
    %c0_i32_0 = arith.constant 0 : i32
    %c0_i32_1 = arith.constant 0 : i32
    return %c0_i32, %c0_i32_0 : i32, i32
  }
  func.func @transform_2(%arg0: i32, %arg1: i32) -> (i32, i32) {
    %c0_i32 = arith.constant 0 : i32
    %c0_i32_0 = arith.constant 0 : i32
    %c0_i32_1 = arith.constant 0 : i32
    return %c0_i32, %c0_i32_0 : i32, i32
  }
  func.func @transform_3(%arg0: i32, %arg1: i32) -> (i32, i32) {
    %c0_i32 = arith.constant 0 : i32
    %c0_i32_0 = arith.constant 0 : i32
    return %c0_i32, %arg1 : i32, i32
  }
  func.func @transform_4(%arg0: i32, %arg1: i32) -> (i32, i32) {
    %c0_i32 = arith.constant 0 : i32
    %c0_i32_0 = arith.constant 0 : i32
    return %c0_i32, %arg1 : i32, i32
  }
  func.func @transform_5(%arg0: i32, %arg1: i32) -> (i32, i32) {
    %c0_i32 = arith.constant 0 : i32
    return %arg0, %arg1 : i32, i32
  }
}

</mosaic_0001>

<bundles_post_ra>
// kernel: tpu_custom_call.1
= control target key start
LH: loop header
LB: loop body
LE: loop exit
PB: predicated region body
PF: predicated region fallthrough
CT: control target
= control target key end

     0   :  { %10 = vsyncpa [#allocation4], 0  ;;  %s426_s0 = inlined_call_operand.hbm [shape: f32[16,32], index: 0, kind: input, shape index: {}]   ;;  %s427_s1 = inlined_call_operand.vmem [shape: f32[1,32], index: 1, kind: input, shape index: {}]   ;;  %s428_s2 = inlined_call_operand.vmem [shape: f32[1,32], index: 2, kind: input, shape index: {}]   ;;  %s429_s3 = inlined_call_operand.hbm [shape: f32[32,128], index: 3, kind: input, shape index: {}]   ;;  %s430_s4 = inlined_call_operand.vmem [shape: f32[1,128], index: 4, kind: input, shape index: {}]   ;;  %s431_s5 = inlined_call_operand.hbm [shape: f32[16,128], index: 5, kind: output, shape index: {}]  }
   0x1   :  { %11 = vsyncpa [#allocation7], 0 }
   0x2   :  { %12 = vsyncpa [#allocation5], 0  ;;  %s329_s18 = smov [#allocation3]   ;;  %s257_s22 = scalar_lea.hbm %s426_s0, 256 }
   0x3   :  { %s18_s19 = sshll.u32 %s329_s18, 4  ;;  %p258_p0 = scmp.ne.s32.totalorder %s426_s0, %s257_s22  ;;  %s19_s19 = int_to_ptr.vmem [resolvable:$true] %s18_s19 }
   0x4   :  { %p261_p1 = scmp.lt.u32.totalorder %s257_s22, %s426_s0 }
   0x6   :  { %p263_p2 = pnand %p261_p1, %p258_p0 }
   0x8   :  { %266 = shalt.err (!%p263_p2)
}
   0x9   :  { %s267_s27 = scalar_lea.vmem %s19_s19, 256  ;;  %p272_p4 = scmp.lt.s32.totalorder %s19_s19, %s19_s19 }
   0xa   :  { %p268_p3 = scmp.ne.s32.totalorder %s19_s19, %s267_s27  ;;  %p273_p5 = scmp.lt.s32.totalorder %s267_s27, %s267_s27 }
   0xc   :  { %p274_p6 = por %p273_p5, %p272_p4 }
   0xe   :  { %p275_p7 = pnand %p274_p6, %p268_p3 }
  0x10   :  { %278 = shalt.err (!%p275_p7)
}
  0x11   :  { %s330_s28 = smov 128   ;;  %s331_s29 = smov 8  }
  0x12   :  { %24 = dma.hbm_to_vmem [thread:$0]  %s426_s0, 256, %s19_s19, [#allocation4], %s330_s28, %s330_s28, %s331_s29  }
  0x13   :  { %s332_s7 = smov [#allocation6]   ;;  %s279_s11 = scalar_lea.hbm %s429_s3, 512 }
  0x14   :  { %s34_s8 = sshll.u32 %s332_s7, 4  ;;  %p280_p8 = scmp.ne.s32.totalorder %s429_s3, %s279_s11  ;;  %s35_s8 = int_to_ptr.vmem [resolvable:$true] %s34_s8 }
  0x15   :  { %p283_p9 = scmp.lt.u32.totalorder %s279_s11, %s429_s3 }
  0x17   :  { %p285_p10 = pnand %p283_p9, %p280_p8 }
  0x19   :  { %288 = shalt.err (!%p285_p10)
}
  0x1a   :  { %s289_s16 = scalar_lea.vmem %s35_s8, 512  ;;  %p294_p12 = scmp.lt.s32.totalorder %s35_s8, %s35_s8 }
  0x1b   :  { %p290_p11 = scmp.ne.s32.totalorder %s35_s8, %s289_s16  ;;  %p295_p13 = scmp.lt.s32.totalorder %s289_s16, %s289_s16 }
  0x1d   :  { %p296_p0 = por %p295_p13, %p294_p12 }
  0x1f   :  { %p297_p1 = pnand %p296_p0, %p290_p11 }
  0x21   :  { %300 = shalt.err (!%p297_p1)
}
  0x22   :  { %40 = dma.hbm_to_vmem [thread:$0]  %s429_s3, 512, %s35_s8, [#allocation7], %s330_s28, %s330_s28, %s331_s29  }
  0x23   :  { %323 = dma.done.wait [#allocation4], 256  }
  0x24   :  { %324 = vsyncadd [#allocation4], 4294967040 }
  0x25   :  { %325 = dma.done.wait [#allocation7], 512  }
  0x26   :  { %326 = vsyncadd [#allocation7], 4294966784  ;;  %vm55_vm0 = vcmask 261120   ;;  %v53_v0 = vld [vmem:[#allocation3] sm:$0xff]  ;;  %v54_v1 = vld [vmem:[#allocation3 + $0x8] sm:$0xff] }
  0x27   :  { %v56_v2 = vsel %vm55_vm0, %v53_v0, 0.0  ;;  %v59_v3 = vsel %vm55_vm0, %v54_v1, 0.0  ;;  %v105_v14 = vld [vmem:[#allocation6] sm:$0xff]  ;;  %v106_v15 = vld [vmem:[#allocation6 + $0x8] sm:$0xff]  ;;  %v107_v17 = vld [vmem:[#allocation6 + $0x10] sm:$0xff] }
  0x28   :  { %57 = vadd.xlane.f32.xlu0 %v56_v2  ;;  %v240_v16 = vpack.c.bf16 %v106_v15, %v105_v14  ;;  %v108_v18 = vld [vmem:[#allocation6 + $0x18] sm:$0xff]  ;;  %v218_v27 = vld [vmem:[%s427_s1] ss:$0 sm:$0xff] }
  0x29   :  { %v244_v19 = vpack.c.bf16 %v108_v18, %v107_v17  ;;  %v219_v29 = vld [vmem:[%s428_s2] ss:$0 sm:$0xff]  ;;  %s333_s2 = smov [#allocation8]  }
  0x2a   :  { %241 = vmatprep.subr.bf16.mxu0 %v240_v16  ;;  %v220_v38 = vld [vmem:[%s430_s4] ss:$0 sm:$0xff]  ;;  %s205_s22 = sshll.u32 %s333_s2, 4  ;;  %s206_s22 = int_to_ptr.vmem [resolvable:$true] %s205_s22 }
  0x2b   :  { %243 = vmatpush3.bf16.msra.mxu0 %v240_v16  ;;  %s301_s23 = scalar_lea.vmem %s206_s22, 256  ;;  %p306_p3 = scmp.lt.s32.totalorder %s206_s22, %s206_s22 }
  0x2c   :  { %60 = vadd.xlane.f32.xlu0 %v59_v3  ;;  %245 = vmatprep.subr.bf16.mxu0 %v244_v19  ;;  %p302_p2 = scmp.ne.s32.totalorder %s206_s22, %s301_s23  ;;  %p307_p4 = scmp.lt.s32.totalorder %s301_s23, %s301_s23 }
  0x2e   :  { %p308_p5 = por %p307_p4, %p306_p3 }
  0x2f   :  { %247 = vmatpush3.bf16.msra.mxu0 %v244_v19 }
  0x30   :  { %p309_p6 = pnand %p308_p5, %p302_p2 }
  0xb5   :  { %v58_v4 = vpop.xlane.xlu0 %57 }
  0xb6   :  { %v63_v5 = vmul.f32 0.03125, %v58_v4 }
  0xb8   :  { %v65_v6 = vsub.f32 %v53_v0, %v63_v5 }
  0xb9   :  { %v61_v7 = vpop.xlane.xlu0 %60 }
  0xba   :  { %v64_v8 = vmul.f32 0.03125, %v61_v7  ;;  %v67_v9 = vmul.f32 %v65_v6, %v65_v6 }
  0xbc   :  { %v66_v10 = vsub.f32 %v54_v1, %v64_v8  ;;  %v69_v11 = vsel %vm55_vm0, %v67_v9, 0.0 }
  0xbd   :  { %70 = vadd.xlane.f32.xlu1 %v69_v11 }
  0xbe   :  { %v68_v12 = vmul.f32 %v66_v10, %v66_v10 }
  0xc0   :  { %v72_v13 = vsel %vm55_vm0, %v68_v12, 0.0 }
  0xc1   :  { %73 = vadd.xlane.f32.xlu1 %v72_v13 }
 0x14a   :  { %v71_v20 = vpop.xlane.xlu1 %70 }
 0x14b   :  { %v75_v21 = vmul.f32 0.03125, %v71_v20 }
 0x14d   :  { %v77_v22 = vadd.f32 1e-05, %v75_v21 }
 0x14e   :  { %v74_v23 = vpop.xlane.xlu1 %73 }
 0x14f   :  { %253 = vrsqrt.f32 %v77_v22  ;;  %v76_v24 = vmul.f32 0.03125, %v74_v23 }
 0x151   :  { %v78_v25 = vadd.f32 1e-05, %v76_v24 }
 0x153   :  { %255 = vrsqrt.f32 %v78_v25 }
 0x159   :  { %v254_v26 = vpop.eup %253 }
 0x15a   :  { %v81_v28 = vmul.f32 %v254_v26, %v65_v6 }
 0x15c   :  { %v90_v30 = vmul.f32 %v218_v27, %v81_v28 }
 0x15d   :  { %v256_v31 = vpop.eup %255 }
 0x15e   :  { %v99_v32 = vadd.f32 %v219_v29, %v90_v30  ;;  %v82_v33 = vmul.f32 %v256_v31, %v66_v10 }
 0x160   :  { %101 = vst.msk [vmem:[#allocation2] sm:$0xff] %vm55_vm0, %v99_v32  ;;  %v91_v34 = vmul.f32 %v218_v27, %v82_v33 }
 0x162   :  { %v100_v35 = vadd.f32 %v219_v29, %v91_v34 }
 0x164   :  { %102 = vst.msk [vmem:[#allocation2 + $0x8] sm:$0xff] %vm55_vm0, %v100_v35 }
 0x167   :  { %v103_v36 = vld [vmem:[#allocation2] sm:$0xff] }
 0x168   :  { %237 = vmatprep.mubr.msk.f32.mxu0 %vm55_vm0, %v103_v36 }
 0x16b   :  { %v104_v37 = vld [vmem:[#allocation2 + $0x8] sm:$0xff] }
 0x16c   :  { %238 = vmatmul.mubr.msk.f32.vlgmr.msra.gmra.mrb[0].mxu0 %vm55_vm0, %v104_v37 }
 0x23f   :  { %v239_v39 = vpop.f32.mrb[0].mxu0 }
 0x240   :  { %v195_v40 = vadd.f32 %v239_v39, %v220_v38  ;;  %v189_v41 = vpop.f32.mrb[1].mxu0 }
 0x241   :  { %v190_v42 = vadd.f32 %v220_v38, %v189_v41 }
 0x242   :  { %199 = vst [vmem:[#allocation8 + $0x8] sm:$0xff] %v195_v40 }
 0x243   :  { %198 = vst [vmem:[#allocation8] sm:$0xff] %v190_v42 }
 0x244   :  { %312 = shalt.err (!%p309_p6)
}
 0x245   :  { %s313_s4 = scalar_lea.hbm %s431_s5, 256 }
 0x246   :  { %p314_p7 = scmp.ne.s32.totalorder %s431_s5, %s313_s4  ;;  %p317_p8 = scmp.lt.u32.totalorder %s313_s4, %s431_s5 }
 0x248   :  { %p319_p9 = pnand %p317_p8, %p314_p7 }
 0x24a   :  { %322 = shalt.err (!%p319_p9)
}
 0x24b   :  { %211 = dma.vmem_to_hbm [thread:$0]  %s206_s22, 256, %s431_s5, [#allocation5], %s330_s28, %s330_s28, %s331_s29  }
 0x24c   :  { %327 = dma.done.wait [#allocation5], 256  }
 0x24d   :  { %328 = vsyncadd [#allocation5], 4294967040 }
 0x24e   :  { %215 = vsyncpa [#allocation4], 1 }
 0x24f   :  { %216 = vsyncpa [#allocation7], 1 }
 0x250   :  { %217 = vsyncpa [#allocation5], 1 }

</bundles_post_ra>
